<compile_context>
chip_gen: v7x
topology: tpu7x:2x2x1
jax: 0.10.0
libtpu: 0.0.40
codegen_flags: <defaults>
</compile_context>

<pallas_src>
import functools

import jax
import jax.numpy as jnp
from jax.experimental import pallas as pl
from jax.experimental.pallas import tpu as pltpu


def _linear_bn_relu_kernel(x_ref, w_ref, gamma_ref, beta_ref, o_ref,
                           *, eps: float, apply_relu: bool):
    # Linear (bias omitted: cancelled by BN mean subtraction in training mode).
    y = jnp.dot(x_ref[...], w_ref[...], preferred_element_type=jnp.float32)

    # BatchNorm1d, training semantics: per-feature batch mean / biased variance.
    mean = jnp.mean(y, axis=0, keepdims=True)
    diff = y - mean
    var = jnp.mean(diff * diff, axis=0, keepdims=True)
    y_hat = diff * jax.lax.rsqrt(var + eps)
    out = gamma_ref[...] * y_hat + beta_ref[...]

    if apply_relu:
        out = jnp.maximum(out, 0.0)

    o_ref[...] = out.astype(o_ref.dtype)


def linear_unit(x, weight_t, bias, gamma, beta, *, eps=1e-5,
                none_linearity=True, tn=128):
    """Pallas forward of LinearUnit.

    x:        [B, F_in]        float32
    weight_t: [F_in, F_out]    (PyTorch weight [F_out, F_in], transposed)
    bias:     [F_out]          accepted for state_dict parity; unused in the
                               kernel because training-mode BN cancels it.
    gamma:    [F_out]          BN weight
    beta:     [F_out]          BN bias
    tn:       F_out tile width (multiple of 128; use 256 for large layers).
    """
    del bias  # mathematically a no-op under training-mode BatchNorm1d
    B, F_in = x.shape
    F_out = weight_t.shape[1]

    # Pad the feature axis to a lane-dense multiple of tn. Padded columns have
    # zero weights -> y == 0, var == 0, y_hat == 0, out == beta_pad == 0, so
    # slicing them off afterwards is exact (rsqrt(eps) is finite, no NaNs).
    f_pad = pl.cdiv(F_out, tn) * tn
    pad = f_pad - F_out
    if pad:
        weight_t = jnp.pad(weight_t, ((0, 0), (0, pad)))
        gamma = jnp.pad(gamma, (0, pad), constant_values=1.0)
        beta = jnp.pad(beta, (0, pad))

    gamma2 = gamma.reshape(1, f_pad)
    beta2 = beta.reshape(1, f_pad)

    kernel = functools.partial(_linear_bn_relu_kernel,
                               eps=eps, apply_relu=none_linearity)

    out_padded = pl.pallas_call(
        kernel,
        out_shape=jax.ShapeDtypeStruct((B, f_pad), x.dtype),
        grid=(f_pad // tn,),
        in_specs=[
            # x: whole batch, constant block index -> stays resident in VMEM.
            pl.BlockSpec((B, F_in), lambda j: (0, 0)),
            # W / gamma / beta tiled along the (lane-dense) feature axis.
            pl.BlockSpec((F_in, tn), lambda j: (0, j)),
            pl.BlockSpec((1, tn), lambda j: (0, j)),
            pl.BlockSpec((1, tn), lambda j: (0, j)),
        ],
        out_specs=pl.BlockSpec((B, tn), lambda j: (0, j)),
        compiler_params=pltpu.CompilerParams(
            dimension_semantics=("parallel",)),
    )(x, weight_t, gamma2, beta2)

    return out_padded[:, :F_out] if pad else out_padded


def reference(x, weight_t, bias, gamma, beta, *, eps=1e-5, none_linearity=True):
    """Pure-JAX reference of the full PyTorch module (bias included)."""
    y = x @ weight_t + bias
    mean = jnp.mean(y, axis=0, keepdims=True)
    var = jnp.mean((y - mean) ** 2, axis=0, keepdims=True)
    out = gamma * (y - mean) / jnp.sqrt(var + eps) + beta
    if none_linearity:
        out = jnp.maximum(out, 0.0)
    return out


if __name__ == "__main__":
    key = jax.random.PRNGKey(0)
    B, F_in, F_out = 8, 32, 64

    k_x, k_w, k_b = jax.random.split(key, 3)

    x = jax.random.normal(k_x, (B, F_in), dtype=jnp.float32)

    # Kaiming-normal style init for the linear weight (PyTorch layout), BN
    # defaults gamma=1, beta=0, plus a small non-zero bias to exercise the
    # "bias is cancelled by BN" property.
    std = (2.0 / F_in) ** 0.5
    weight = std * jax.random.normal(k_w, (F_out, F_in), dtype=jnp.float32)
    weight_t = weight.T                                             # [F_in, F_out]
    bias = 0.01 * jax.random.normal(k_b, (F_out,), dtype=jnp.float32)
    gamma = jnp.ones((F_out,), dtype=jnp.float32)
    beta = jnp.zeros((F_out,), dtype=jnp.float32)

    # With ReLU (default module config).
    out = linear_unit(x, weight_t, bias, gamma, beta)
    out = jax.block_until_ready(out)
    ref = reference(x, weight_t, bias, gamma, beta)
    assert out.shape == (B, F_out)
    assert jnp.allclose(out, ref, atol=1e-4, rtol=1e-4), "mismatch vs reference (ReLU)"

    # Without ReLU (none_linearity=False path).
    out_nl = linear_unit(x, weight_t, bias, gamma, beta, none_linearity=False)
    out_nl = jax.block_until_ready(out_nl)
    ref_nl = reference(x, weight_t, bias, gamma, beta, none_linearity=False)
    assert jnp.allclose(out_nl, ref_nl, atol=1e-4, rtol=1e-4), "mismatch vs reference (no ReLU)"

    print("KERNEL_OK")
</pallas_src>

<mosaic_0001>
module attributes {stable_mosaic.version = 11 : i64} {
  func.func @_linear_bn_relu_kernel(%arg0: i32, %arg1: memref<8x32xf32, #tpu.memory_space<vmem>>, %arg2: memref<32x128xf32, #tpu.memory_space<vmem>>, %arg3: memref<1x128xf32, #tpu.memory_space<vmem>>, %arg4: memref<1x128xf32, #tpu.memory_space<vmem>>, %arg5: memref<8x128xf32, #tpu.memory_space<vmem>>) attributes {dimension_semantics = [#tpu.dimension_semantics<parallel>], iteration_bounds = array<i64: 1>, scalar_prefetch = 0 : i64, scratch_operands = 0 : i64, tpu.core_type = #tpu.core_type<tc>, window_params = [{pipeline_mode = #tpu.pipeline_mode<synchronous>, transform_indices = @transform_0, window_bounds = array<i64: 8, 32>}, {transform_indices = @transform_1, window_bounds = array<i64: 32, 128>}, {transform_indices = @transform_2, window_bounds = array<i64: 1, 128>}, {transform_indices = @transform_3, window_bounds = array<i64: 1, 128>}, {transform_indices = @transform_4, window_bounds = array<i64: 8, 128>}]} {
    %c0 = arith.constant 0 : index
    %c0_0 = arith.constant 0 : index
    %0 = vector.load %arg1[%c0, %c0_0] : memref<8x32xf32, #tpu.memory_space<vmem>>, vector<8x32xf32>
    %c0_1 = arith.constant 0 : index
    %c0_2 = arith.constant 0 : index
    %1 = vector.load %arg2[%c0_1, %c0_2] : memref<32x128xf32, #tpu.memory_space<vmem>>, vector<32x128xf32>
    %cst = arith.constant dense<0.000000e+00> : vector<8x128xf32>
    %2 = tpu.matmul %0, %1, %cst {dimension_numbers = #tpu.dot_dimension_numbers<[1], [0], [0], [1], [0, 0, 1, 1], [], []>} : vector<8x32xf32>, vector<32x128xf32>, vector<8x128xf32> -> vector<8x128xf32>
    %cst_3 = arith.constant dense<0.000000e+00> : vector<128xf32>
    %3 = vector.multi_reduction <add>, %2, %cst_3 [0] : vector<8x128xf32> to vector<128xf32>
    %4 = vector.shape_cast %3 : vector<128xf32> to vector<1x128xf32>
    %cst_4 = arith.constant 8.000000e+00 : f32
    %5 = vector.broadcast %cst_4 : f32 to vector<1x128xf32>
    %6 = arith.divf %4, %5 : vector<1x128xf32>
    %7 = vector.broadcast %6 : vector<1x128xf32> to vector<8x128xf32>
    %8 = arith.subf %2, %7 : vector<8x128xf32>
    %9 = arith.mulf %8, %8 : vector<8x128xf32>
    %cst_5 = arith.constant dense<0.000000e+00> : vector<128xf32>
    %10 = vector.multi_reduction <add>, %9, %cst_5 [0] : vector<8x128xf32> to vector<128xf32>
    %11 = vector.shape_cast %10 : vector<128xf32> to vector<1x128xf32>
    %cst_6 = arith.constant 8.000000e+00 : f32
    %12 = vector.broadcast %cst_6 : f32 to vector<1x128xf32>
    %13 = arith.divf %11, %12 : vector<1x128xf32>
    %cst_7 = arith.constant 9.99999974E-6 : f32
    %14 = vector.broadcast %cst_7 : f32 to vector<1x128xf32>
    %15 = arith.addf %13, %14 : vector<1x128xf32>
    %16 = math.rsqrt %15 : vector<1x128xf32>
    %17 = vector.broadcast %16 : vector<1x128xf32> to vector<8x128xf32>
    %18 = arith.mulf %8, %17 : vector<8x128xf32>
    %c0_8 = arith.constant 0 : index
    %c0_9 = arith.constant 0 : index
    %19 = vector.load %arg3[%c0_8, %c0_9] : memref<1x128xf32, #tpu.memory_space<vmem>>, vector<1x128xf32>
    %20 = vector.broadcast %19 : vector<1x128xf32> to vector<8x128xf32>
    %21 = arith.mulf %20, %18 : vector<8x128xf32>
    %c0_10 = arith.constant 0 : index
    %c0_11 = arith.constant 0 : index
    %22 = vector.load %arg4[%c0_10, %c0_11] : memref<1x128xf32, #tpu.memory_space<vmem>>, vector<1x128xf32>
    %23 = vector.broadcast %22 : vector<1x128xf32> to vector<8x128xf32>
    %24 = arith.addf %21, %23 : vector<8x128xf32>
    %cst_12 = arith.constant 0.000000e+00 : f32
    %25 = vector.broadcast %cst_12 : f32 to vector<8x128xf32>
    %26 = arith.maximumf %24, %25 : vector<8x128xf32>
    %c0_13 = arith.constant 0 : index
    %c0_14 = arith.constant 0 : index
    %27 = vector.load %arg5[%c0_13, %c0_14] : memref<8x128xf32, #tpu.memory_space<vmem>>, vector<8x128xf32>
    tpu.vector_store %arg5[%c0_13, %c0_14], %26 {strides = array<i32>} : memref<8x128xf32, #tpu.memory_space<vmem>>, vector<8x128xf32>,
    return
  }
  func.func @transform_0(%arg0: i32) -> (i32, i32) {
    %c0_i32 = arith.constant 0 : i32
    %c0_i32_0 = arith.constant 0 : i32
    %c0_i32_1 = arith.constant 0 : i32
    return %c0_i32, %c0_i32_0 : i32, i32
  }
  func.func @transform_1(%arg0: i32) -> (i32, i32) {
    %c0_i32 = arith.constant 0 : i32
    %c0_i32_0 = arith.constant 0 : i32
    return %c0_i32, %arg0 : i32, i32
  }
  func.func @transform_2(%arg0: i32) -> (i32, i32) {
    %c0_i32 = arith.constant 0 : i32
    %c0_i32_0 = arith.constant 0 : i32
    return %c0_i32, %arg0 : i32, i32
  }
  func.func @transform_3(%arg0: i32) -> (i32, i32) {
    %c0_i32 = arith.constant 0 : i32
    %c0_i32_0 = arith.constant 0 : i32
    return %c0_i32, %arg0 : i32, i32
  }
  func.func @transform_4(%arg0: i32) -> (i32, i32) {
    %c0_i32 = arith.constant 0 : i32
    %c0_i32_0 = arith.constant 0 : i32
    return %c0_i32, %arg0 : i32, i32
  }
}

</mosaic_0001>

<bundles_post_ra>
// kernel: tpu_custom_call.1
= control target key start
LH: loop header
LB: loop body
LE: loop exit
PB: predicated region body
PF: predicated region fallthrough
CT: control target
= control target key end

     0   :  { %9 = vsyncpa [#allocation3], 0  ;;  %s366_s0 = inlined_call_operand.hbm [shape: f32[8,32], index: 0, kind: input, shape index: {}]   ;;  %s367_s1 = inlined_call_operand.hbm [shape: f32[32,128], index: 1, kind: input, shape index: {}]   ;;  %s368_s2 = inlined_call_operand.vmem [shape: f32[1,128], index: 2, kind: input, shape index: {}]   ;;  %s369_s3 = inlined_call_operand.vmem [shape: f32[1,128], index: 3, kind: input, shape index: {}]   ;;  %s370_s4 = inlined_call_operand.hbm [shape: f32[8,128], index: 4, kind: output, shape index: {}]  }
   0x1   :  { %10 = vsyncpa [#allocation6], 0 }
   0x2   :  { %11 = vsyncpa [#allocation4], 0  ;;  %s284_s15 = smov [#allocation2]   ;;  %s285_s17 = smov [#allocation5]  }
   0x3   :  { %s18_s16 = sshll.u32 %s284_s15, 4  ;;  %s27_s18 = sshll.u32 %s285_s17, 4  ;;  %s19_s16 = int_to_ptr.vmem [resolvable:$true] %s18_s16  ;;  %s317_s18 = int_to_ptr.vmem [resolvable:$true] %s27_s18 }
   0x4   :  { %s212_s21 = scalar_lea.hbm %s366_s0, 128 }
   0x5   :  { %p213_p0 = scmp.ne.s32.totalorder %s366_s0, %s212_s21  ;;  %p216_p1 = scmp.lt.u32.totalorder %s212_s21, %s366_s0 }
   0x7   :  { %p218_p2 = pnand %p216_p1, %p213_p0 }
   0x9   :  { %221 = shalt.err (!%p218_p2)
}
   0xa   :  { %s222_s26 = scalar_lea.vmem %s19_s16, 128  ;;  %p227_p4 = scmp.lt.s32.totalorder %s19_s16, %s19_s16 }
   0xb   :  { %p223_p3 = scmp.ne.s32.totalorder %s19_s16, %s222_s26  ;;  %p228_p5 = scmp.lt.s32.totalorder %s222_s26, %s222_s26 }
   0xd   :  { %p229_p6 = por %p228_p5, %p227_p4 }
   0xf   :  { %p230_p7 = pnand %p229_p6, %p223_p3 }
  0x11   :  { %233 = shalt.err (!%p230_p7)
}
  0x12   :  { %21 = dma.hbm_to_vmem [thread:$0]  %s366_s0, 128, %s19_s16, [#allocation3]  }
  0x13   :  { %s234_s5 = scalar_lea.hbm %s367_s1, 512 }
  0x14   :  { %p235_p8 = scmp.ne.s32.totalorder %s367_s1, %s234_s5  ;;  %p238_p9 = scmp.lt.u32.totalorder %s234_s5, %s367_s1 }
  0x16   :  { %p240_p10 = pnand %p238_p9, %p235_p8 }
  0x18   :  { %243 = shalt.err (!%p240_p10)
}
  0x19   :  { %s244_s10 = scalar_lea.vmem %s317_s18, 512  ;;  %p249_p12 = scmp.lt.s32.totalorder %s317_s18, %s317_s18 }
  0x1a   :  { %p245_p11 = scmp.ne.s32.totalorder %s317_s18, %s244_s10  ;;  %p250_p13 = scmp.lt.s32.totalorder %s244_s10, %s244_s10 }
  0x1c   :  { %p251_p0 = por %p250_p13, %p249_p12 }
  0x1e   :  { %p252_p1 = pnand %p251_p0, %p245_p11 }
  0x20   :  { %255 = shalt.err (!%p252_p1)
}
  0x21   :  { %s286_s0 = smov 128   ;;  %s287_s11 = smov 8  }
  0x22   :  { %33 = dma.hbm_to_vmem [thread:$0]  %s367_s1, 512, %s317_s18, [#allocation6], %s286_s0, %s286_s0, %s287_s11  }
  0x23   :  { %278 = dma.done.wait [#allocation3], 128  }
  0x24   :  { %279 = vsyncadd [#allocation3], 4294967168 }
  0x25   :  { %280 = dma.done.wait [#allocation6], 512  }
  0x26   :  { %281 = vsyncadd [#allocation6], 4294966784  ;;  %v288_v0 = vmov 0.0|0.0   ;;  %vm289_vm0 = vmmov 0   ;;  %v290_v1 = vmov 0.0   ;;  %v45_v2 = vld [vmem:[#allocation5] sm:$0xff] }
  0x27   :  { %196 = vmatprep.subr.bf16.mxu0 %v288_v0  ;;  %193 = vmatprep.mubr.msk.f32.mxu0 %vm289_vm0, %v290_v1  ;;  %v46_v3 = vld [vmem:[#allocation5 + $0x8] sm:$0xff]  ;;  %v47_v4 = vld [vmem:[#allocation5 + $0x10] sm:$0xff]  ;;  %v48_v6 = vld [vmem:[#allocation5 + $0x18] sm:$0xff]  ;;  %vm49_vm1 = vcmask 261120   ;;  %s291_s17 = smov [#allocation7]  }
  0x28   :  { %v197_v5 = vpack.c.bf16 %v46_v3, %v45_v2  ;;  %v200_v7 = vpack.c.bf16 %v48_v6, %v47_v4  ;;  %v44_v8 = vld [vmem:[#allocation2] sm:$0xff]  ;;  %s167_s18 = sshll.u32 %s291_s17, 4  ;;  %s168_s18 = int_to_ptr.vmem [resolvable:$true] %s167_s18 }
  0x29   :  { %v178_v29 = vld [vmem:[%s368_s2] ss:$0 sm:$0xff]  ;;  %s256_s19 = scalar_lea.vmem %s168_s18, 128  ;;  %p261_p3 = scmp.lt.s32.totalorder %s168_s18, %s168_s18 }
  0x2a   :  { %198 = vmatpush3.bf16.msra.mxu0 %v197_v5  ;;  %v179_v31 = vld [vmem:[%s369_s3] ss:$0 sm:$0xff]  ;;  %p257_p2 = scmp.ne.s32.totalorder %s168_s18, %s256_s19  ;;  %p262_p4 = scmp.lt.s32.totalorder %s256_s19, %s256_s19 }
  0x2b   :  { %199 = vmatprep.subr.bf16.mxu0 %v288_v0 }
  0x2c   :  { %p263_p5 = por %p262_p4, %p261_p3 }
  0x2e   :  { %201 = vmatpush3.bf16.msra.mxu0 %v200_v7  ;;  %p264_p6 = pnand %p263_p5, %p257_p2 }
  0x31   :  { %194 = vmatmul.mubr.msk.f32.vlgmr.msra.gmra.mrb[0].mxu0 %vm49_vm1, %v44_v8 }
 0x104   :  { %v119_v9 = vpop.f32.mrb[0].mxu0 }
 0x105   :  { %v123_v10 = vrot.slane %v119_v9, 4  ;;  %v195_v11 = vpop.f32.mrb[1].mxu0 }
 0x107   :  { %v124_v12 = vadd.f32 %v123_v10, %v119_v9 }
 0x109   :  { %v125_v13 = vrot.slane %v124_v12, 2 }
 0x10b   :  { %v126_v14 = vadd.f32 %v125_v13, %v124_v12 }
 0x10d   :  { %v127_v15 = vrot.slane %v126_v14, 1 }
 0x10f   :  { %v128_v16 = vadd.f32 %v127_v15, %v126_v14 }
 0x111   :  { %v130_v17 = vmul.f32 0.125, %v128_v16 }
 0x113   :  { %v131_v18 = vsub.f32 %v119_v9, %v130_v17 }
 0x115   :  { %v132_v19 = vmul.f32 %v131_v18, %v131_v18 }
 0x117   :  { %v133_v20 = vrot.slane %v132_v19, 4 }
 0x119   :  { %v134_v21 = vadd.f32 %v133_v20, %v132_v19 }
 0x11b   :  { %v135_v22 = vrot.slane %v134_v21, 2 }
 0x11d   :  { %v136_v23 = vadd.f32 %v135_v22, %v134_v21 }
 0x11f   :  { %v137_v24 = vrot.slane %v136_v23, 1 }
 0x121   :  { %v138_v25 = vadd.f32 %v137_v24, %v136_v23 }
 0x123   :  { %v139_v26 = vmul.f32 0.125, %v138_v25 }
 0x125   :  { %v140_v27 = vadd.f32 1e-05, %v139_v26 }
 0x127   :  { %210 = vrsqrt.f32 %v140_v27 }
 0x131   :  { %v211_v28 = vpop.eup %210 }
 0x132   :  { %v142_v30 = vmul.f32 %v211_v28, %v131_v18 }
 0x134   :  { %v150_v32 = vmul.f32 %v178_v29, %v142_v30 }
 0x136   :  { %v158_v33 = vadd.f32 %v179_v31, %v150_v32 }
 0x138   :  { %v159_v34 = vmax.f32 %v158_v33, 0.0 }
 0x13a   :  { %160 = vst [vmem:[#allocation7] sm:$0xff] %v159_v34 }
 0x13b   :  { %267 = shalt.err (!%p264_p6)
}
 0x13c   :  { %s268_s21 = scalar_lea.hbm %s370_s4, 128 }
 0x13d   :  { %p269_p7 = scmp.ne.s32.totalorder %s370_s4, %s268_s21  ;;  %p272_p8 = scmp.lt.u32.totalorder %s268_s21, %s370_s4 }
 0x13f   :  { %p274_p9 = pnand %p272_p8, %p269_p7 }
 0x141   :  { %277 = shalt.err (!%p274_p9)
}
 0x142   :  { %170 = dma.vmem_to_hbm [thread:$0]  %s168_s18, 128, %s370_s4, [#allocation4]  }
 0x143   :  { %282 = dma.done.wait [#allocation4], 128  }
 0x144   :  { %283 = vsyncadd [#allocation4], 4294967168 }
 0x145   :  { %174 = vsyncpa [#allocation3], 1 }
 0x146   :  { %175 = vsyncpa [#allocation6], 1 }
 0x147   :  { %176 = vsyncpa [#allocation4], 1 }

</bundles_post_ra>
